<compile_context>
chip_gen: v7x
topology: tpu7x:2x2x1
jax: 0.10.0
libtpu: 0.0.40
codegen_flags: <defaults>
</compile_context>

<pallas_src>
import numpy as np
import jax
import jax.numpy as jnp
from jax.experimental import pallas as pl
from jax.experimental.pallas import tpu as pltpu


# --------------------------------------------------------------------------
# Kernel: fused 2x2 / stride-2 max pool on a (tr, 2*Wc) row-pair block
# --------------------------------------------------------------------------
def _maxpool2x2_kernel(x_ref, sel_ref, o_ref):
    """x_ref : (tr, 2*Wc) -- row r = [source row 2i | source row 2i+1] (lanes)
    sel_ref: (2, Wc, Wout) -- exact 0/1 even / odd column selection matrices
    o_ref  : (tr, Wout)
    """
    wc = sel_ref.shape[1]

    # Pool over the H pair: two static lane slices + elementwise max (VPU).
    h = jnp.maximum(x_ref[:, :wc], x_ref[:, wc:]).astype(jnp.float32)   # (tr, Wc)

    # Pool over W pairs: compact even/odd columns with exact 0/1 matmuls on the
    # (otherwise idle) MXU, then elementwise max.  Exact: selectors are 0.0/1.0.
    even = jnp.dot(h, sel_ref[0], preferred_element_type=jnp.float32)   # (tr, Wout)
    odd = jnp.dot(h, sel_ref[1], preferred_element_type=jnp.float32)

    o_ref[...] = jnp.maximum(even, odd).astype(o_ref.dtype)


def _pick_row_tile(R, bytes_per_row, target_bytes=2 * 1024 * 1024, max_rows=2048):
    """Row-tile: multiple of 8, ~target_bytes of input per block."""
    cap = max(8, min(max_rows, target_bytes // max(1, bytes_per_row)))
    cap = max(8, (cap // 8) * 8)
    if R <= cap:
        return R                      # full axis (always legal)
    for d in range(cap, 7, -8):       # prefer an exact divisor
        if R % d == 0:
            return d
    return cap                        # ragged last block; Pallas masks it


# --------------------------------------------------------------------------
# Public wrapper: NCHW in, NCHW out (PyTorch MaxPool2d(2, 2) semantics)
# --------------------------------------------------------------------------
def maxpool2x2(x):
    N, C, H, W = x.shape
    Hout, Wout = H // 2, W // 2

    # PyTorch MaxPool2d floors: a trailing odd row / column is dropped (no-op if even).
    x = x[:, :, : 2 * Hout, : 2 * Wout]
    Wc = 2 * Wout
    R = N * C * Hout

    # Free, contiguous reshape: each output row keeps its two source rows adjacent
    # along the lane axis.
    xr = x.reshape(R, 2 * Wc)

    # Exact 0/1 even/odd column selectors (constant under jit, DMA'd to VMEM once).
    idx = np.arange(Wout)
    sel_np = np.zeros((2, Wc, Wout), np.float32)
    sel_np[0, 2 * idx, idx] = 1.0
    sel_np[1, 2 * idx + 1, idx] = 1.0
    sel = jnp.asarray(sel_np)

    tr = _pick_row_tile(R, bytes_per_row=2 * Wc * x.dtype.itemsize)
    grid = (pl.cdiv(R, tr),)

    out = pl.pallas_call(
        _maxpool2x2_kernel,
        out_shape=jax.ShapeDtypeStruct((R, Wout), x.dtype),
        grid=grid,
        in_specs=[
            pl.BlockSpec((tr, 2 * Wc), lambda i: (i, 0)),
            pl.BlockSpec((2, Wc, Wout), lambda i: (0, 0, 0)),
        ],
        out_specs=pl.BlockSpec((tr, Wout), lambda i: (i, 0)),
        compiler_params=pltpu.CompilerParams(
            dimension_semantics=("parallel",),
            vmem_limit_bytes=32 * 1024 * 1024,
        ),
    )(xr, sel)

    return out.reshape(N, C, Hout, Wout)


# --------------------------------------------------------------------------
if __name__ == "__main__":
    key = jax.random.PRNGKey(0)
    N, C, H, W = 2, 4, 16, 16
    x = jax.random.normal(key, (N, C, H, W), jnp.float32)

    fwd = jax.jit(maxpool2x2)
    out = fwd(x)
    jax.block_until_ready(out)

    assert out.shape == (N, C, H // 2, W // 2), out.shape
    ref = jnp.max(x.reshape(N, C, H // 2, 2, W // 2, 2), axis=(3, 5))
    assert bool(jnp.all(jnp.isfinite(out)))
    assert bool(jnp.allclose(out, ref)), float(jnp.max(jnp.abs(out - ref)))
    print("KERNEL_OK")
</pallas_src>

<mosaic_0001>
module attributes {stable_mosaic.version = 11 : i64} {
  func.func @_maxpool2x2_kernel(%arg0: i32, %arg1: memref<64x32xf32, #tpu.memory_space<vmem>>, %arg2: memref<2x16x8xf32, #tpu.memory_space<vmem>>, %arg3: memref<64x8xf32, #tpu.memory_space<vmem>>) attributes {dimension_semantics = [#tpu.dimension_semantics<parallel>], iteration_bounds = array<i64: 1>, scalar_prefetch = 0 : i64, scratch_operands = 0 : i64, tpu.core_type = #tpu.core_type<tc>, window_params = [{transform_indices = @transform_0, window_bounds = array<i64: 64, 32>}, {pipeline_mode = #tpu.pipeline_mode<synchronous>, transform_indices = @transform_1, window_bounds = array<i64: 2, 16, 8>}, {transform_indices = @transform_2, window_bounds = array<i64: 64, 8>}]} {
    %c0 = arith.constant 0 : index
    %c0_0 = arith.constant 0 : index
    %0 = vector.load %arg1[%c0, %c0_0] : memref<64x32xf32, #tpu.memory_space<vmem>>, vector<64x16xf32>
    %c0_1 = arith.constant 0 : index
    %c16 = arith.constant 16 : index
    %1 = vector.load %arg1[%c0_1, %c16] : memref<64x32xf32, #tpu.memory_space<vmem>>, vector<64x16xf32>
    %2 = arith.maximumf %0, %1 : vector<64x16xf32>
    %c0_2 = arith.constant 0 : index
    %c0_3 = arith.constant 0 : index
    %c0_4 = arith.constant 0 : index
    %3 = vector.load %arg2[%c0_2, %c0_3, %c0_4] : memref<2x16x8xf32, #tpu.memory_space<vmem>>, vector<1x16x8xf32>
    %4 = vector.shape_cast %3 : vector<1x16x8xf32> to vector<16x8xf32>
    %cst = arith.constant dense<0.000000e+00> : vector<64x8xf32>
    %5 = tpu.matmul %2, %4, %cst {dimension_numbers = #tpu.dot_dimension_numbers<[1], [0], [0], [1], [0, 0, 1, 1], [], []>} : vector<64x16xf32>, vector<16x8xf32>, vector<64x8xf32> -> vector<64x8xf32>
    %c1 = arith.constant 1 : index
    %c0_5 = arith.constant 0 : index
    %c0_6 = arith.constant 0 : index
    %6 = vector.load %arg2[%c1, %c0_5, %c0_6] : memref<2x16x8xf32, #tpu.memory_space<vmem>>, vector<1x16x8xf32>
    %7 = vector.shape_cast %6 : vector<1x16x8xf32> to vector<16x8xf32>
    %cst_7 = arith.constant dense<0.000000e+00> : vector<64x8xf32>
    %8 = tpu.matmul %2, %7, %cst_7 {dimension_numbers = #tpu.dot_dimension_numbers<[1], [0], [0], [1], [0, 0, 1, 1], [], []>} : vector<64x16xf32>, vector<16x8xf32>, vector<64x8xf32> -> vector<64x8xf32>
    %9 = arith.maximumf %5, %8 : vector<64x8xf32>
    %c0_8 = arith.constant 0 : index
    %c0_9 = arith.constant 0 : index
    %10 = vector.load %arg3[%c0_8, %c0_9] : memref<64x8xf32, #tpu.memory_space<vmem>>, vector<64x8xf32>
    tpu.vector_store %arg3[%c0_8, %c0_9], %9 {strides = array<i32>} : memref<64x8xf32, #tpu.memory_space<vmem>>, vector<64x8xf32>,
    return
  }
  func.func @transform_0(%arg0: i32) -> (i32, i32) {
    %c0_i32 = arith.constant 0 : i32
    %c0_i32_0 = arith.constant 0 : i32
    return %arg0, %c0_i32 : i32, i32
  }
  func.func @transform_1(%arg0: i32) -> (i32, i32, i32) {
    %c0_i32 = arith.constant 0 : i32
    %c0_i32_0 = arith.constant 0 : i32
    %c0_i32_1 = arith.constant 0 : i32
    %c0_i32_2 = arith.constant 0 : i32
    return %c0_i32, %c0_i32_0, %c0_i32_1 : i32, i32, i32
  }
  func.func @transform_2(%arg0: i32) -> (i32, i32) {
    %c0_i32 = arith.constant 0 : i32
    %c0_i32_0 = arith.constant 0 : i32
    return %arg0, %c0_i32 : i32, i32
  }
}

</mosaic_0001>

<bundles_post_ra>
// kernel: maxpool2x2.1
= control target key start
LH: loop header
LB: loop body
LE: loop exit
PB: predicated region body
PF: predicated region fallthrough
CT: control target
= control target key end

     0   :  { %s439_s13 = smov 112   ;;  %s530_s0 = inlined_call_operand.vmem [shape: f32[64,32], index: 0, kind: input, shape index: {}]   ;;  %s531_s1 = inlined_call_operand.vmem [shape: f32[2,16,8], index: 1, kind: input, shape index: {}]   ;;  %s532_s2 = inlined_call_operand.hbm [shape: f32[64,8], index: 2, kind: output, shape index: {}]  }
   0x1   :  { %v12_v0 = vld [vmem:[%s530_s0] sm:$0xff]  ;;  %v14_v1 = vld [vmem:[%s530_s0 + $0x10] sm:$0xff]  ;;  %v13_v2 = vld [vmem:[%s530_s0 + $0x8] sm:$0xff] }
   0x2   :  { %28 = vrot.lane.b32.xlu0 %v12_v0, %s439_s13  ;;  %32 = vrot.lane.b32.xlu1 %v14_v1, %s439_s13  ;;  %v15_v3 = vld [vmem:[%s530_s0 + $0x18] sm:$0xff]  ;;  %v60_v4 = vld [vmem:[%s531_s1] sm:$0xff] }
   0x3   :  { %v61_v5 = vld [vmem:[%s531_s1 + $0x8] sm:$0xff]  ;;  %v341_v6 = vld [vmem:[%s531_s1 + $0x10] sm:$0xff]  ;;  %v342_v8 = vld [vmem:[%s531_s1 + $0x18] sm:$0xff] }
   0x4   :  { %v403_v7 = vpack.c.bf16 %v61_v5, %v60_v4 }
   0x5   :  { %7 = vsyncpa [#allocation3], 0  ;;  %v407_v9 = vpack.c.bf16 %v342_v8, %v341_v6  ;;  %v16_v10 = vld [vmem:[%s530_s0 + $0x20] sm:$0xff]  ;;  %v17_v11 = vld [vmem:[%s530_s0 + $0x28] sm:$0xff]  ;;  %vm62_vm0 = vcmask 130048   ;;  %vm308_vm1 = vcmask 64512  }
   0x6   :  { %30 = vrot.lane.b32.xlu0 %v13_v2, %s439_s13  ;;  %34 = vrot.lane.b32.xlu1 %v15_v3, %s439_s13  ;;  %v18_v12 = vld [vmem:[%s530_s0 + $0x30] sm:$0xff]  ;;  %v19_v13 = vld [vmem:[%s530_s0 + $0x38] sm:$0xff]  ;;  %s440_s0 = smov [#allocation2]  }
   0x7   :  { %404 = vmatprep.subr.bf16.mxu0 %v403_v7  ;;  %408 = vmatprep.subr.bf16.mxu1 %v407_v9  ;;  %s322_s5 = sshll.u32 %s440_s0, 4  ;;  %s323_s5 = int_to_ptr.vmem [resolvable:$true] %s322_s5 }
   0x8   :  { %406 = vmatpush3.bf16.msra.mxu0 %v403_v7  ;;  %410 = vmatpush3.bf16.msra.mxu1 %v407_v9  ;;  %s415_s6 = scalar_lea.vmem %s323_s5, 1024  ;;  %p420_p1 = scmp.lt.s32.totalorder %s323_s5, %s323_s5 }
   0x9   :  { %p416_p0 = scmp.ne.s32.totalorder %s323_s5, %s415_s6  ;;  %p421_p2 = scmp.lt.s32.totalorder %s415_s6, %s415_s6 }
   0xa   :  { %36 = vrot.lane.b32.xlu0 %v16_v10, %s439_s13  ;;  %38 = vrot.lane.b32.xlu1 %v17_v11, %s439_s13 }
   0xb   :  { %p422_p3 = por %p421_p2, %p420_p1 }
   0xd   :  { %p423_p4 = pnand %p422_p3, %p416_p0 }
   0xe   :  { %40 = vrot.lane.b32.xlu0 %v18_v12, %s439_s13  ;;  %42 = vrot.lane.b32.xlu1 %v19_v13, %s439_s13 }
  0x74   :  { %v29_v14 = vpop.permute.xlu0 %28  ;;  %v33_v15 = vpop.permute.xlu1 %32 }
  0x75   :  { %v52_v16 = vmax.f32 %v12_v0, %v29_v14  ;;  %v54_v17 = vmax.f32 %v14_v1, %v33_v15 }
  0x77   :  { %375 = vmatprep.mubr.msk.f32.mxu0 %vm62_vm0, %v52_v16  ;;  %391 = vmatprep.mubr.msk.f32.mxu1 %vm62_vm0, %v52_v16 }
  0x78   :  { %v31_v18 = vpop.permute.xlu0 %30  ;;  %v35_v19 = vpop.permute.xlu1 %34 }
  0x79   :  { %v53_v20 = vmax.f32 %v13_v2, %v31_v18  ;;  %v55_v21 = vmax.f32 %v15_v3, %v35_v19 }
  0x7b   :  { %376 = vmatmul.mubr.msk.f32.vlgmr.msra.gmra.mrb[0].mxu0 %vm62_vm0, %v53_v20  ;;  %392 = vmatmul.mubr.msk.f32.vlgmr.msra.gmra.mrb[0].mxu1 %vm62_vm0, %v53_v20 }
  0x7c   :  { %378 = vmatprep.mubr.msk.f32.mxu0 %vm62_vm0, %v54_v17  ;;  %394 = vmatprep.mubr.msk.f32.mxu1 %vm62_vm0, %v54_v17  ;;  %v37_v22 = vpop.permute.xlu0 %36  ;;  %v39_v23 = vpop.permute.xlu1 %38 }
  0x7d   :  { %v56_v24 = vmax.f32 %v16_v10, %v37_v22  ;;  %v57_v25 = vmax.f32 %v17_v11, %v39_v23 }
  0x7f   :  { %379 = vmatmul.mubr.msk.f32.gmra.mrb[2].mxu0 %vm62_vm0, %v55_v21  ;;  %395 = vmatmul.mubr.msk.f32.gmra.mrb[2].mxu1 %vm62_vm0, %v55_v21 }
  0x80   :  { %381 = vmatprep.mubr.msk.f32.mxu0 %vm62_vm0, %v56_v24  ;;  %397 = vmatprep.mubr.msk.f32.mxu1 %vm62_vm0, %v56_v24  ;;  %v41_v26 = vpop.permute.xlu0 %40  ;;  %v43_v27 = vpop.permute.xlu1 %42 }
  0x81   :  { %v58_v28 = vmax.f32 %v18_v12, %v41_v26  ;;  %v59_v29 = vmax.f32 %v19_v13, %v43_v27 }
  0x83   :  { %382 = vmatmul.mubr.msk.f32.gmra.mrb[4].mxu0 %vm62_vm0, %v57_v25  ;;  %398 = vmatmul.mubr.msk.f32.gmra.mrb[4].mxu1 %vm62_vm0, %v57_v25 }
  0x84   :  { %384 = vmatprep.mubr.msk.f32.mxu0 %vm62_vm0, %v58_v28  ;;  %400 = vmatprep.mubr.msk.f32.mxu1 %vm62_vm0, %v58_v28 }
  0x87   :  { %385 = vmatmul.mubr.msk.f32.gmra.mrb[6].mxu0 %vm62_vm0, %v59_v29  ;;  %401 = vmatmul.mubr.msk.f32.gmra.mrb[6].mxu1 %vm62_vm0, %v59_v29 }
 0x14e   :  { %v377_v30 = vpop.f32.mrb[0].mxu0  ;;  %v393_v31 = vpop.f32.mrb[0].mxu1 }
 0x14f   :  { %v301_v32 = vmax.f32 %v377_v30, %v393_v31  ;;  %v153_v33 = vpop.f32.mrb[1].mxu0  ;;  %v261_v34 = vpop.f32.mrb[1].mxu1 }
 0x150   :  { %v300_v35 = vmax.f32 %v153_v33, %v261_v34 }
 0x151   :  { %310 = vst.msk [vmem:[#allocation2 + $0x8] sm:$0xff] %vm308_vm1, %v301_v32 }
 0x152   :  { %309 = vst.msk [vmem:[#allocation2] sm:$0xff] %vm308_vm1, %v300_v35  ;;  %v380_v36 = vpop.f32.mrb[2].mxu0  ;;  %v396_v37 = vpop.f32.mrb[2].mxu1 }
 0x153   :  { %v303_v38 = vmax.f32 %v380_v36, %v396_v37  ;;  %v163_v39 = vpop.f32.mrb[3].mxu0  ;;  %v271_v40 = vpop.f32.mrb[3].mxu1 }
 0x154   :  { %v302_v41 = vmax.f32 %v163_v39, %v271_v40 }
 0x155   :  { %312 = vst.msk [vmem:[#allocation2 + $0x18] sm:$0xff] %vm308_vm1, %v303_v38 }
 0x156   :  { %311 = vst.msk [vmem:[#allocation2 + $0x10] sm:$0xff] %vm308_vm1, %v302_v41  ;;  %v383_v42 = vpop.f32.mrb[4].mxu0  ;;  %v399_v43 = vpop.f32.mrb[4].mxu1 }
 0x157   :  { %v305_v44 = vmax.f32 %v383_v42, %v399_v43  ;;  %v173_v45 = vpop.f32.mrb[5].mxu0  ;;  %v281_v46 = vpop.f32.mrb[5].mxu1 }
 0x158   :  { %v304_v47 = vmax.f32 %v173_v45, %v281_v46 }
 0x159   :  { %314 = vst.msk [vmem:[#allocation2 + $0x28] sm:$0xff] %vm308_vm1, %v305_v44 }
 0x15a   :  { %313 = vst.msk [vmem:[#allocation2 + $0x20] sm:$0xff] %vm308_vm1, %v304_v47  ;;  %v386_v48 = vpop.f32.mrb[6].mxu0  ;;  %v402_v49 = vpop.f32.mrb[6].mxu1 }
 0x15b   :  { %v307_v50 = vmax.f32 %v386_v48, %v402_v49  ;;  %v183_v51 = vpop.f32.mrb[7].mxu0  ;;  %v291_v52 = vpop.f32.mrb[7].mxu1 }
 0x15c   :  { %v306_v53 = vmax.f32 %v183_v51, %v291_v52 }
 0x15d   :  { %316 = vst.msk [vmem:[#allocation2 + $0x38] sm:$0xff] %vm308_vm1, %v307_v50 }
 0x15e   :  { %315 = vst.msk [vmem:[#allocation2 + $0x30] sm:$0xff] %vm308_vm1, %v306_v53 }
 0x15f   :  { %426 = shalt.err (!%p423_p4)
}
 0x160   :  { %s427_s9 = scalar_lea.hbm %s532_s2, 1024 }
 0x161   :  { %p428_p5 = scmp.ne.s32.totalorder %s532_s2, %s427_s9  ;;  %p431_p6 = scmp.lt.u32.totalorder %s427_s9, %s532_s2 }
 0x163   :  { %p433_p7 = pnand %p431_p6, %p428_p5 }
 0x165   :  { %436 = shalt.err (!%p433_p7)
}
 0x166   :  { %s441_s14 = smov 128   ;;  %s442_s15 = smov 8  }
 0x167   :  { %328 = dma.vmem_to_hbm [thread:$0]  %s323_s5, 1024, %s532_s2, [#allocation3], %s441_s14, %s441_s14, %s442_s15  }
 0x168   :  { %437 = dma.done.wait [#allocation3], 1024  }
 0x169   :  { %438 = vsyncadd [#allocation3], 4294966272 }
 0x16a   :  { %332 = vsyncpa [#allocation3], 1 }

</bundles_post_ra>
